<compile_context>
chip_gen: v5e
topology: v5e:2x2
jax: 0.10.0
libtpu: 0.0.40
codegen_flags: <defaults>
</compile_context>

<pallas_src>
import jax
import jax.numpy as jnp
from jax import lax
from jax.experimental import pallas as pl
from jax.experimental.pallas import tpu as pltpu


# ---------------- Pallas kernel: single lane-dense MXU block ------------------
def _conv_bias_kernel(w_ref, p_ref, o_ref):
    # w_ref: (COUT_PAD=64, K_PAD=256)  reordered weights, bias folded at column K
    # p_ref: (K_PAD=256,  N*M=128)     im2col patches, batch folded into lanes,
    #                                  ones row at k==K, zero rows above
    # o_ref: (COUT_PAD=64, N*M=128)    conv+bias output (lane-dense, unmasked stores)
    o_ref[...] = jnp.dot(
        w_ref[...], p_ref[...],
        preferred_element_type=jnp.float32,
        precision=lax.Precision.HIGHEST,   # full-f32 MXU passes for K=252 contraction
    )


def _fused_conv(w_t, p):
    cout_pad, _ = w_t.shape
    nm = p.shape[1]
    return pl.pallas_call(
        _conv_bias_kernel,
        out_shape=jax.ShapeDtypeStruct((cout_pad, nm), jnp.float32),
        in_specs=[
            pl.BlockSpec(memory_space=pltpu.MemorySpace.VMEM),
            pl.BlockSpec(memory_space=pltpu.MemorySpace.VMEM),
        ],
        out_specs=pl.BlockSpec(memory_space=pltpu.MemorySpace.VMEM),
    )(w_t, p)


def model_forward(x, conv_w, conv_b):
    """Model.forward: leaky_relu(conv(x), slope=1.0) == conv(x) + b (identity)."""
    N, Cin, H, W = x.shape
    Cout, _, kh, kw = conv_w.shape
    stride, pad = 2, 2
    OH = (H + 2 * pad - kh) // stride + 1
    OW = (W + 2 * pad - kw) // stride + 1
    M = OH * OW                                   # 64 pixels per batch element
    NM = N * M                                    # 128: batch folded into lanes
    K = Cin * kh * kw                             # 252
    K_PAD = ((K + 1 + 127) // 128) * 128          # 256 (room for bias row, tile aligned)
    COUT_PAD = ((Cout + 63) // 64) * 64           # 49 -> 64 (sublane dim: x8 suffices)

    # ---- im2col built directly in the kernel's lane-dense (K_PAD, N*M) layout ----
    # channel-major input so each strided slice reshapes straight to (Cin, N*M)
    xp = jnp.pad(jnp.transpose(x, (1, 0, 2, 3)),
                 ((0, 0), (0, 0), (pad, pad), (pad, pad)))       # (Cin, N, H+4, W+4)
    rows = []
    for di in range(kh):
        for dj in range(kw):
            s = xp[:, :,
                   di:di + stride * (OH - 1) + 1:stride,
                   dj:dj + stride * (OW - 1) + 1:stride]         # (Cin, N, OH, OW)
            rows.append(s.reshape(Cin, NM))                      # cols = n*M + oh*OW + ow
    rows.append(jnp.ones((1, NM), x.dtype))                      # bias row at k == K
    rows.append(jnp.zeros((K_PAD - K - 1, NM), x.dtype))         # tile-align pad rows
    p = jnp.concatenate(rows, axis=0)                            # (256, 128)

    # ---- weights reordered to k = (di, dj, ci); bias folded at column K ----
    w_t = jnp.transpose(conv_w, (0, 2, 3, 1)).reshape(Cout, K)   # (49, 252)
    w_t = jnp.concatenate(
        [w_t, conv_b[:, None], jnp.zeros((Cout, K_PAD - K - 1), w_t.dtype)], axis=1)
    w_t = jnp.pad(w_t, ((0, COUT_PAD - Cout), (0, 0)))           # (64, 256)

    out = _fused_conv(w_t, p)                                    # (64, 128)

    # leaky_relu(slope=1.0) is the identity; conv_copy (v5) is unused dead code.
    # Drop pad channels, unflatten pixels, tiny (Cout, N, 8, 8) swapaxes -> NCHW.
    return jnp.swapaxes(out[:Cout].reshape(Cout, N, OH, OW), 0, 1)


if __name__ == "__main__":
    key = jax.random.PRNGKey(0)
    k1, k2, k3 = jax.random.split(key, 3)

    # Conv2d(7, 49, kernel_size=6, stride=2, padding=2)
    Cin, Cout, Kk = 7, 49, 6
    fan_in = Cin * Kk * Kk
    bound = 1.0 / (fan_in ** 0.5)
    conv_w = jax.random.uniform(k1, (Cout, Cin, Kk, Kk), jnp.float32, -bound, bound)
    conv_b = jax.random.uniform(k2, (Cout,), jnp.float32, -bound, bound)

    # input: batch=2, channels=7 (module requires 7), spatial=16x16
    x = jax.random.normal(k3, (2, 7, 16, 16), jnp.float32)

    fwd = jax.jit(model_forward)
    y = fwd(x, conv_w, conv_b)
    jax.block_until_ready(y)

    # reference check against XLA conv (leaky_relu slope=1.0 is identity)
    ref = lax.conv_general_dilated(
        x, conv_w, window_strides=(2, 2), padding=((2, 2), (2, 2)),
        dimension_numbers=("NCHW", "OIHW", "NCHW"),
        precision=lax.Precision.HIGHEST,
    ) + conv_b[None, :, None, None]
    assert y.shape == ref.shape == (2, 49, 8, 8)
    assert jnp.allclose(y, ref, atol=1e-3, rtol=1e-3)

    print("KERNEL_OK")
</pallas_src>

<mosaic_0001>
module attributes {stable_mosaic.version = 11 : i64} {
  func.func @_conv_bias_kernel(%arg0: memref<64x256xf32, #tpu.memory_space<vmem>>, %arg1: memref<256x128xf32, #tpu.memory_space<vmem>>, %arg2: memref<64x128xf32, #tpu.memory_space<vmem>>) attributes {dimension_semantics = [], scalar_prefetch = 0 : i64, scratch_operands = 0 : i64, tpu.core_type = #tpu.core_type<tc>} {
    %c0 = arith.constant 0 : index
    %c0_0 = arith.constant 0 : index
    %0 = vector.load %arg0[%c0, %c0_0] : memref<64x256xf32, #tpu.memory_space<vmem>>, vector<64x256xf32>
    %c0_1 = arith.constant 0 : index
    %c0_2 = arith.constant 0 : index
    %1 = vector.load %arg1[%c0_1, %c0_2] : memref<256x128xf32, #tpu.memory_space<vmem>>, vector<256x128xf32>
    %cst = arith.constant dense<0.000000e+00> : vector<64x128xf32>
    %2 = tpu.matmul %0, %1, %cst {dimension_numbers = #tpu.dot_dimension_numbers<[1], [0], [0], [1], [0, 0, 1, 1], [], []>, precision = #tpu.contract_precision<fp32>} : vector<64x256xf32>, vector<256x128xf32>, vector<64x128xf32> -> vector<64x128xf32>
    %c0_3 = arith.constant 0 : index
    %c0_4 = arith.constant 0 : index
    %3 = vector.load %arg2[%c0_3, %c0_4] : memref<64x128xf32, #tpu.memory_space<vmem>>, vector<64x128xf32>
    tpu.vector_store %arg2[%c0_3, %c0_4], %2 {strides = array<i32>} : memref<64x128xf32, #tpu.memory_space<vmem>>, vector<64x128xf32>,
    return
  }
}

</mosaic_0001>

<bundles_post_ra>
// kernel: model_forward.1
= control target key start
LH: loop header
LB: loop body
LE: loop exit
PB: predicated region body
PF: predicated region fallthrough
CT: control target
= control target key end

     0   :  { %s2134_s1 = inlined_call_operand.vmem [shape: f32[256,128], index: 1, kind: input, shape index: {}]   ;;  %s2135_s0 = inlined_call_operand.vmem [shape: f32[64,256], index: 0, kind: input, shape index: {}]   ;;  %s2136_s2 = inlined_call_operand.vmem [shape: f32[64,128], index: 2, kind: output, shape index: {}]  }
   0x1   :  { %v42_v0 = vld [vmem:[%s2134_s1 + $0x78] sm:$0xff]  ;;  %v41_v1 = vld [vmem:[%s2134_s1 + $0x70] sm:$0xff]  ;;  %v40_v2 = vld [vmem:[%s2134_s1 + $0x68] sm:$0xff] }
   0x2   :  { %v1211_v3 = vand.u32 4294901760, %v42_v0  ;;  %v1213_v4 = vand.u32 4294901760, %v41_v1  ;;  %v1215_v5 = vand.u32 4294901760, %v40_v2  ;;  %v39_v6 = vld [vmem:[%s2134_s1 + $0x60] sm:$0xff]  ;;  %v38_v7 = vld [vmem:[%s2134_s1 + $0x58] sm:$0xff]  ;;  %v37_v8 = vld [vmem:[%s2134_s1 + $0x50] sm:$0xff] }
   0x3   :  { %v1226_v9 = vand.u32 4294901760, %v39_v6  ;;  %v1228_v10 = vand.u32 4294901760, %v38_v7  ;;  %v1230_v11 = vand.u32 4294901760, %v37_v8  ;;  %v36_v12 = vld [vmem:[%s2134_s1 + $0x48] sm:$0xff]  ;;  %v35_v13 = vld [vmem:[%s2134_s1 + $0x40] sm:$0xff]  ;;  %v34_v18 = vld [vmem:[%s2134_s1 + $0x38] sm:$0xff] }
   0x4   :  { %60 = vmatpush.msra.mxu0 %v1211_v3  ;;  %v1240_v14 = vsub.f32 %v42_v0, %v1211_v3  ;;  %v1243_v15 = vsub.f32 %v41_v1, %v1213_v4  ;;  %375 = vmatpush.msra.mxu3 %v1211_v3  ;;  %v1247_v16 = vsub.f32 %v40_v2, %v1215_v5  ;;  %v1249_v17 = vand.u32 4294901760, %v36_v12  ;;  %v33_v26 = vld [vmem:[%s2134_s1 + $0x30] sm:$0xff]  ;;  %v32_v36 = vld [vmem:[%s2134_s1 + $0x28] sm:$0xff]  ;;  %v31_v43 = vld [vmem:[%s2134_s1 + $0x20] sm:$0xff] }
   0x5   :  { %v1255_v19 = vsub.f32 %v39_v6, %v1226_v9  ;;  %v1258_v20 = vsub.f32 %v38_v7, %v1228_v10  ;;  %v1261_v21 = vsub.f32 %v37_v8, %v1230_v11  ;;  %v1268_v25 = vand.u32 4294901760, %v35_v13  ;;  %v30_v49 = vld [vmem:[%s2134_s1 + $0x18] sm:$0xff]  ;;  %v29_v55 = vld [vmem:[%s2134_s1 + $0x10] sm:$0xff]  ;;  %v11_v56 = vld [vmem:[%s2135_s0] sm:$0xff] }
   0x6   :  { %62 = vmatpush.msra.mxu0 %v1213_v4  ;;  %287 = vmatpush.msra.mxu2 %v1240_v14  ;;  %v2152_v22 = vand.u32 4294901760, %v1240_v14  ;;  %v2149_v23 = vand.u32 4294901760, %v1243_v15  ;;  %v2147_v24 = vand.u32 4294901760, %v1247_v16  ;;  %v1275_v28 = vand.u32 4294901760, %v34_v18  ;;  %v28_v60 = vld [vmem:[%s2134_s1 + $0x8] sm:$0xff]  ;;  %v58_v63 = vld [vmem:[%s2134_s1 + $0xf8] sm:$0xff] }
   0x7   :  { %377 = vmatpush.msra.mxu3 %v1213_v4  ;;  %v2146_v27 = vand.u32 4294901760, %v1255_v19  ;;  %v1278_v29 = vsub.f32 %v36_v12, %v1249_v17  ;;  %v2145_v33 = vand.u32 4294901760, %v1258_v20  ;;  %v1293_v34 = vand.u32 4294901760, %v33_v26 }
   0x8   :  { %64 = vmatpush.msra.mxu0 %v1215_v5  ;;  %290 = vmatpush.msra.mxu2 %v1243_v15  ;;  %v159_v30 = vsub.f32 %v1240_v14, %v2152_v22  ;;  %v165_v31 = vsub.f32 %v1243_v15, %v2149_v23  ;;  %v171_v32 = vsub.f32 %v1247_v16, %v2147_v24  ;;  %v2144_v35 = vand.u32 4294901760, %v1261_v21  ;;  %v52_v22 = vld [vmem:[%s2134_s1 + $0xc8] sm:$0xff] }
   0x9   :  { %379 = vmatpush.msra.mxu3 %v1215_v5  ;;  %v177_v39 = vsub.f32 %v1255_v19, %v2146_v27  ;;  %v1305_v40 = vsub.f32 %v35_v13, %v1268_v25  ;;  %v2143_v41 = vand.u32 4294901760, %v1278_v29  ;;  %v1310_v42 = vsub.f32 %v34_v18, %v1275_v28  ;;  %v27_v13 = vld [vmem:[%s2134_s1] sm:$0xff] }
   0xa   :  { %66 = vmatpush.msra.mxu0 %v1226_v9  ;;  %v160_v37 = vand.u32 4294901760, %v159_v30  ;;  %293 = vmatpush.msra.mxu2 %v1247_v16  ;;  %v166_v38 = vand.u32 4294901760, %v165_v31  ;;  %v172_v44 = vand.u32 4294901760, %v171_v32  ;;  %v183_v45 = vsub.f32 %v1258_v20, %v2145_v33  ;;  %v13_v32 = vld [vmem:[%s2135_s0 + $0x10] sm:$0xff] }
   0xb   :  { %381 = vmatpush.msra.mxu3 %v1226_v9  ;;  %v1319_v46 = vand.u32 4294901760, %v32_v36  ;;  %v189_v47 = vsub.f32 %v1261_v21, %v2144_v35  ;;  %v1327_v48 = vsub.f32 %v33_v26, %v1293_v34  ;;  %v178_v50 = vand.u32 4294901760, %v177_v39 }
   0xc   :  { %68 = vmatpush.msra.mxu0 %v1228_v10  ;;  %161 = vmatpush.msra.mxu1 %v160_v37  ;;  %v1333_v51 = vand.u32 4294901760, %v31_v43  ;;  %v2141_v52 = vand.u32 4294901760, %v1305_v40  ;;  %v195_v53 = vsub.f32 %v1278_v29, %v2143_v41  ;;  %v2140_v54 = vand.u32 4294901760, %v1310_v42 }
   0xd   :  { %296 = vmatpush.msra.mxu2 %v1255_v19  ;;  %383 = vmatpush.msra.mxu3 %v1228_v10  ;;  %v184_v57 = vand.u32 4294901760, %v183_v45  ;;  %v1349_v58 = vand.u32 4294901760, %v30_v49  ;;  %v1352_v59 = vsub.f32 %v32_v36, %v1319_v46  ;;  %v190_v61 = vand.u32 4294901760, %v189_v47  ;;  %v57_v36 = vld [vmem:[%s2134_s1 + $0xf0] sm:$0xff] }
   0xe   :  { %70 = vmatpush.msra.mxu0 %v1230_v11  ;;  %167 = vmatpush.msra.mxu1 %v166_v38  ;;  %v2139_v62 = vand.u32 4294901760, %v1327_v48  ;;  %v201_v0 = vsub.f32 %v1305_v40, %v2141_v52  ;;  %v1367_v1 = vand.u32 4294901760, %v29_v55  ;;  %v1370_v2 = vsub.f32 %v31_v43, %v1333_v51  ;;  %v15_v52 = vld [vmem:[%s2135_s0 + $0x20] sm:$0xff] }
   0xf   :  { %299 = vmatpush.msra.mxu2 %v1258_v20  ;;  %385 = vmatpush.msra.mxu3 %v1230_v11  ;;  %v1372_v6 = vand.u32 4294901760, %v11_v56  ;;  %v196_v7 = vand.u32 4294901760, %v195_v53  ;;  %v207_v8 = vsub.f32 %v1310_v42, %v2140_v54  ;;  %v1379_v12 = vand.u32 4294901760, %v28_v60 }
  0x10   :  { %72 = vmatpush.msra.mxu0 %v1249_v17  ;;  %173 = vmatpush.msra.mxu1 %v172_v44  ;;  %v2138_v18 = vand.u32 4294901760, %v1352_v59  ;;  %v1387_v26 = vsub.f32 %v30_v49, %v1349_v58  ;;  %v1392_v31 = vand.u32 4294901760, %v58_v63  ;;  %v213_v37 = vsub.f32 %v1327_v48, %v2139_v62 }
  0x11   :  { %302 = vmatpush.msra.mxu2 %v1261_v21  ;;  %387 = vmatpush.msra.mxu3 %v1249_v17  ;;  %v1390_v30 = vsub.f32 %v11_v56, %v1372_v6  ;;  %v202_v38 = vand.u32 4294901760, %v201_v0  ;;  %v1406_v39 = vand.u32 4294901760, %v27_v13  ;;  %v2137_v43 = vand.u32 4294901760, %v1370_v2 }
  0x12   :  { %74 = vmatpush.msra.mxu0 %v1268_v25  ;;  %179 = vmatpush.msra.mxu1 %v178_v50  ;;  %v1410_v44 = vsub.f32 %v29_v55, %v1367_v1  ;;  %v208_v45 = vand.u32 4294901760, %v207_v8  ;;  %v1415_v49 = vand.u32 4294901760, %v13_v32  ;;  %v1417_v50 = vand.u32 4294901760, %v57_v36 }
  0x13   :  { %305 = vmatpush.msra.mxu2 %v1278_v29  ;;  %389 = vmatpush.msra.mxu3 %v1268_v25  ;;  %2174 = vst [vmem:[#allocation2_spill] sm:$0xff] %v1406_v39  ;;  %v2155_v47 = vand.u32 4294901760, %v1390_v30  ;;  %v219_v53 = vsub.f32 %v1352_v59, %v2138_v18  ;;  %v2142_v55 = vand.u32 4294901760, %v1387_v26  ;;  %v1425_v56 = vsub.f32 %v28_v60, %v1379_v12 }
  0x14   :  { %76 = vmatpush.msra.mxu0 %v1275_v28  ;;  %185 = vmatpush.msra.mxu1 %v184_v57  ;;  %v1428_v57 = vsub.f32 %v58_v63, %v1392_v31  ;;  %v214_v0 = vand.u32 4294901760, %v213_v37  ;;  %v225_v60 = vsub.f32 %v1370_v2, %v2137_v43  ;;  %v1441_v63 = vsub.f32 %v27_v13, %v1406_v39  ;;  %v55_v37 = vld [vmem:[%s2134_s1 + $0xe0] sm:$0xff] }
  0x15   :  { %308 = vmatpush.msra.mxu2 %v1305_v40  ;;  %391 = vmatpush.msra.mxu3 %v1275_v28  ;;  %v1444_v8 = vsub.f32 %v57_v36, %v1417_v50  ;;  %v1455_v43 = vsub.f32 %v13_v32, %v1415_v49  ;;  %v220_v36 = vand.u32 4294901760, %v219_v53  ;;  %v231_v18 = vsub.f32 %v1387_v26, %v2142_v55 }
  0x16   :  { %78 = vmatpush.msra.mxu0 %v1293_v34  ;;  %191 = vmatpush.msra.mxu1 %v190_v61  ;;  %2175 = vst [vmem:[#allocation3_spill] sm:$0xff] %v1428_v57  ;;  %v56_v61 = vld [vmem:[%s2134_s1 + $0xe8] sm:$0xff]  ;;  %v2151_v62 = vand.u32 4294901760, %v1425_v56  ;;  %v2150_v54 = vand.u32 4294901760, %v1428_v57  ;;  %v1470_v32 = vand.u32 4294901760, %v55_v37  ;;  %v226_v53 = vand.u32 4294901760, %v225_v60 }
  0x17   :  { %311 = vmatpush.msra.mxu2 %v1310_v42  ;;  %393 = vmatpush.msra.mxu3 %v1293_v34  ;;  %2176 = vst [vmem:[#allocation4_spill] sm:$0xff] %v1441_v63  ;;  %v1457_v13 = vand.u32 4294901760, %v56_v61  ;;  %v2154_v41 = vand.u32 4294901760, %v1441_v63  ;;  %v2153_v35 = vand.u32 4294901760, %v1444_v8  ;;  %v2158_v27 = vand.u32 4294901760, %v1455_v43 }
  0x18   :  { %80 = vmatpush.msra.mxu0 %v1319_v46  ;;  %197 = vmatpush.msra.mxu1 %v196_v7  ;;  %v2148_v7 = vand.u32 4294901760, %v1410_v44  ;;  %2177 = vst [vmem:[#allocation5_spill] sm:$0xff] %v1444_v8  ;;  %v232_v60 = vand.u32 4294901760, %v231_v18  ;;  %v1504_v18 = vsub.f32 %v55_v37, %v1470_v32 }
  0x19   :  { %314 = vmatpush.msra.mxu2 %v1327_v48  ;;  %395 = vmatpush.msra.mxu3 %v1319_v46  ;;  %v1485_v24 = vsub.f32 %v56_v61, %v1457_v13  ;;  %v53_v61 = vld [vmem:[%s2134_s1 + $0xd0] sm:$0xff]  ;;  %v102_v37 = vsub.f32 %v1455_v43, %v2158_v27  ;;  %v2179_v27 = vand.u32 4294901760, %v1390_v30 }
  0x1a   :  { %82 = vmatpush.msra.mxu0 %v1333_v51  ;;  %203 = vmatpush.msra.mxu1 %v202_v38  ;;  %v94_v38 = vsub.f32 %v1390_v30, %v2155_v47  ;;  %v237_v55 = vsub.f32 %v1410_v44, %v2148_v7  ;;  %v243_v7 = vsub.f32 %v1425_v56, %v2151_v62 }
  0x1b   :  { %317 = vmatpush.msra.mxu2 %v1352_v59  ;;  %397 = vmatpush.msra.mxu3 %v1333_v51  ;;  %v723_v62 = vsub.f32 %v1444_v8, %v2153_v35  ;;  %v17_v35 = vld [vmem:[%s2135_s0 + $0x30] sm:$0xff] }
  0x1c   :  { %84 = vmatpush.msra.mxu0 %v1349_v58  ;;  %209 = vmatpush.msra.mxu1 %v208_v45  ;;  %v54_v45 = vld [vmem:[%s2134_s1 + $0xd8] sm:$0xff]  ;;  %v95_v33 = vand.u32 4294901760, %v94_v38  ;;  %v717_v38 = vsub.f32 %v1428_v57, %v2150_v54  ;;  %v249_v54 = vsub.f32 %v1441_v63, %v2154_v41  ;;  %v1527_v41 = vand.u32 4294901760, %v53_v61 }
  0x1d   :  { %320 = vmatpush.msra.mxu2 %v1370_v2  ;;  %399 = vmatpush.msra.mxu3 %v1349_v58  ;;  %v1496_v23 = vand.u32 4294901760, %v54_v45  ;;  %v244_v47 = vand.u32 4294901760, %v243_v7  ;;  %v2180_v57 = vand.u32 4294901760, %v1240_v14  ;;  %v50_v14 = vld [vmem:[%s2134_s1 + $0xb8] sm:$0xff] }
  0x1e   :  { %86 = vmatpush.msra.mxu0 %v1367_v1  ;;  %215 = vmatpush.msra.mxu1 %v214_v0  ;;  %v1487_v0 = vand.u32 4294901760, %v15_v52  ;;  %v250_v7 = vand.u32 4294901760, %v249_v54 }
  0x1f   :  { %323 = vmatpush.msra.mxu2 %v1387_v26  ;;  %401 = vmatpush.msra.mxu3 %v1367_v1  ;;  %v1531_v8 = vsub.f32 %v54_v45, %v1496_v23  ;;  %v1543_v45 = vand.u32 4294901760, %v17_v35 }
  0x20   :  { %2178 = vst [vmem:[#allocation6_spill] sm:$0xff] %v1487_v0  ;;  %88 = vmatpush.msra.mxu0 %v1379_v12  ;;  %221 = vmatpush.msra.mxu1 %v220_v36  ;;  %v238_v36 = vand.u32 4294901760, %v237_v55  ;;  %v1537_v55 = vand.u32 4294901760, %v52_v22 }
  0x21   :  { %326 = vmatpush.msra.mxu2 %v1410_v44  ;;  %403 = vmatpush.msra.mxu3 %v1379_v12  ;;  %v2164_v54 = vand.u32 4294901760, %v1531_v8 }
  0x22   :  { %90 = vmatpush.msra.mxu0 %v1406_v39  ;;  %227 = vmatpush.msra.mxu1 %v226_v53  ;;  %v1522_v53 = vsub.f32 %v15_v52, %v1487_v0  ;;  %v2181_v52 = vand.u32 4294901760, %v1485_v24 }
  0x23   :  { %96 = vmatmul.f32.vlgmr.msra.gmra.mxu0 %v95_v33  ;;  %329 = vmatpush.msra.mxu2 %v1425_v56  ;;  %v718_v33 = vand.u32 4294901760, %v717_v38  ;;  %v724_v38 = vand.u32 4294901760, %v723_v62 }
  0x24   :  { %233 = vmatpush.msra.mxu1 %v232_v60  ;;  %405 = vmatpush.msra.mxu3 %v1406_v39  ;;  %v51_v60 = vld [vmem:[%s2134_s1 + $0xc0] sm:$0xff]  ;;  %v729_v39 = vsub.f32 %v1485_v24, %v2181_v52 }
  0x25   :  { %332 = vmatpush.msra.mxu2 %v1441_v63  ;;  %409 = vmatmul.f32.vlgmr.msra.gmra.mxu3 %v2179_v27  ;;  %v103_v27 = vand.u32 4294901760, %v102_v37  ;;  %v2163_v63 = vand.u32 4294901760, %v1522_v53  ;;  %v1556_v62 = vand.u32 4294901760, %v51_v60  ;;  %v1571_v37 = vsub.f32 %v17_v35, %v1543_v45 }
  0x26   :  { %239 = vmatpush.msra.mxu1 %v238_v36  ;;  %335 = vmatmul.f32.vlgmr.msra.gmra.mxu2 %v1390_v30  ;;  %v1553_v36 = vsub.f32 %v53_v61, %v1527_v41  ;;  %v2182_v30 = vand.u32 4294901760, %v1243_v15  ;;  %v741_v35 = vsub.f32 %v1531_v8, %v2164_v54 }
  0x27   :  { %618 = vmatpush.msrb.mxu2 %v1392_v31  ;;  %458 = vmatpush.msrb.mxu0 %v2180_v57  ;;  %v2183_v57 = vand.u32 4294901760, %v1504_v18  ;;  %v110_v15 = vsub.f32 %v1522_v53, %v2163_v63  ;;  %v117_v54 = vand.u32 4294901760, %v1571_v37 }
  0x28   :  { %245 = vmatpush.msra.mxu1 %v244_v47  ;;  %719 = vmatpush.msrb.mxu3 %v718_v33  ;;  %v1568_v47 = vsub.f32 %v52_v22, %v1537_v55  ;;  %v730_v33 = vand.u32 4294901760, %v729_v39  ;;  %v2165_v52 = vand.u32 4294901760, %v1553_v36  ;;  %v49_v22 = vld [vmem:[%s2134_s1 + $0xb0] sm:$0xff]  ;;  %v19_v39 = vld [vmem:[%s2135_s0 + $0x40] sm:$0xff] }
  0x29   :  { %620 = vmatpush.msrb.mxu2 %v1417_v50  ;;  %462 = vmatpush.msrb.mxu0 %v2182_v30  ;;  %v735_v61 = vsub.f32 %v1504_v18, %v2183_v57  ;;  %v1578_v30 = vand.u32 4294901760, %v50_v14  ;;  %v1599_v63 = vand.u32 4294901760, %v49_v22 }
  0x2a   :  { %251 = vmatpush.msra.mxu1 %v250_v7  ;;  %725 = vmatpush.msrb.mxu3 %v724_v38  ;;  %v1592_v7 = vsub.f32 %v51_v60, %v1556_v62  ;;  %v2184_v38 = vand.u32 4294901760, %v1455_v43  ;;  %v2166_v57 = vand.u32 4294901760, %v1568_v47  ;;  %v48_v60 = vld [vmem:[%s2134_s1 + $0xa8] sm:$0xff] }
  0x2b   :  { %104 = vmatmul.f32.gmra.mxu0 %v103_v27  ;;  %253 = vmatmul.f32.vlgmr.msra.gmra.mxu1 %v1372_v6  ;;  %v2185_v27 = vand.u32 4294901760, %v1247_v16  ;;  %v747_v16 = vsub.f32 %v1553_v36, %v2165_v52 }
  0x2c   :  { %553 = vmatpush.msrb.mxu1 %v1211_v3  ;;  %622 = vmatpush.msrb.mxu2 %v1457_v13  ;;  %v736_v3 = vand.u32 4294901760, %v735_v61  ;;  %v1611_v61 = vand.u32 4294901760, %v19_v39  ;;  %v753_v52 = vsub.f32 %v1568_v47, %v2166_v57 }
  0x2d   :  { %415 = vmatmul.f32.gmra.mxu3 %v2184_v38  ;;  %466 = vmatpush.msrb.mxu0 %v2185_v27  ;;  %v111_v38 = vand.u32 4294901760, %v110_v15  ;;  %v742_v27 = vand.u32 4294901760, %v741_v35  ;;  %v1620_v15 = vand.u32 4294901760, %v48_v60  ;;  %v748_v35 = vand.u32 4294901760, %v747_v16 }
  0x2e   :  { %340 = vmatmul.f32.gmra.mxu2 %v1455_v43  ;;  %555 = vmatpush.msrb.mxu1 %v1213_v4  ;;  %v1614_v43 = vsub.f32 %v50_v14, %v1578_v30  ;;  %v2186_v4 = vand.u32 4294901760, %v1255_v19  ;;  %v1627_v14 = vsub.f32 %v49_v22, %v1599_v63  ;;  %v118_v19 = vsub.f32 %v1571_v37, %v117_v54 }
  0x2f   :  { %731 = vmatpush.msrb.mxu3 %v730_v33  ;;  %624 = vmatpush.msrb.mxu2 %v1470_v32  ;;  %v2167_v33 = vand.u32 4294901760, %v1592_v7  ;;  %v2188_v16 = vand.u32 4294901760, %v1522_v53 }
  0x30   :  { %557 = vmatpush.msrb.mxu1 %v1215_v5  ;;  %470 = vmatpush.msrb.mxu0 %v2186_v4  ;;  %v2187_v5 = vand.u32 4294901760, %v1258_v20  ;;  %v2168_v4 = vand.u32 4294901760, %v1614_v43  ;;  %v47_v20 = vld [vmem:[%s2134_s1 + $0xa0] sm:$0xff]  ;;  %v2170_v57 = vand.u32 4294901760, %v1627_v14 }
  0x31   :  { %737 = vmatpush.msrb.mxu3 %v736_v3  ;;  %626 = vmatpush.msrb.mxu2 %v1496_v23  ;;  %v1637_v3 = vsub.f32 %v19_v39, %v1611_v61  ;;  %v759_v22 = vsub.f32 %v1592_v7, %v2167_v33  ;;  %v1651_v39 = vsub.f32 %v48_v60, %v1620_v15  ;;  %v46_v60 = vld [vmem:[%s2134_s1 + $0x98] sm:$0xff] }
  0x32   :  { %559 = vmatpush.msrb.mxu1 %v1226_v9  ;;  %474 = vmatpush.msrb.mxu0 %v2187_v5  ;;  %v21_v9 = vld [vmem:[%s2135_s0 + $0x50] sm:$0xff]  ;;  %v754_v5 = vand.u32 4294901760, %v753_v52  ;;  %v765_v52 = vsub.f32 %v1614_v43, %v2168_v4 }
  0x33   :  { %112 = vmatmul.f32.gmra.mxu0 %v111_v38  ;;  %257 = vmatmul.f32.gmra.mxu1 %v1415_v49  ;;  %v1653_v38 = vand.u32 4294901760, %v47_v20  ;;  %v1662_v33 = vand.u32 4294901760, %v21_v9  ;;  %v45_v4 = vld [vmem:[%s2134_s1 + $0x90] sm:$0xff] }
  0x34   :  { %743 = vmatpush.msrb.mxu3 %v742_v27  ;;  %561 = vmatpush.msrb.mxu1 %v1228_v10  ;;  %v119_v10 = vand.u32 4294901760, %v118_v19  ;;  %v2189_v27 = vand.u32 4294901760, %v1261_v21  ;;  %v1675_v21 = vand.u32 4294901760, %v46_v60  ;;  %v2190_v19 = vand.u32 4294901760, %v1278_v29 }
  0x35   :  { %421 = vmatmul.f32.gmra.mxu3 %v2188_v16  ;;  %628 = vmatpush.msrb.mxu2 %v1527_v41  ;;  %v2171_v16 = vand.u32 4294901760, %v1637_v3  ;;  %v2191_v29 = vand.u32 4294901760, %v1305_v40  ;;  %v44_v40 = vld [vmem:[%s2134_s1 + $0x88] sm:$0xff] }
  0x36   :  { %345 = vmatmul.f32.gmra.mxu2 %v1522_v53  ;;  %478 = vmatpush.msrb.mxu0 %v2189_v27  ;;  %v1673_v53 = vsub.f32 %v47_v20, %v1653_v38  ;;  %v760_v27 = vand.u32 4294901760, %v759_v22  ;;  %v1686_v20 = vsub.f32 %v46_v60, %v1675_v21  ;;  %v1695_v22 = vsub.f32 %v21_v9, %v1662_v33 }
  0x37   :  { %749 = vmatpush.msrb.mxu3 %v748_v35  ;;  %563 = vmatpush.msrb.mxu1 %v1230_v11  ;;  %v2169_v35 = vand.u32 4294901760, %v1651_v39  ;;  %v771_v11 = vsub.f32 %v1627_v14, %v2170_v57  ;;  %v766_v60 = vand.u32 4294901760, %v765_v52  ;;  %v1717_v52 = vand.u32 4294901760, %v44_v40 }
  0x38   :  { %630 = vmatpush.msrb.mxu2 %v1537_v55  ;;  %482 = vmatpush.msrb.mxu0 %v2190_v19  ;;  %v2192_v57 = vand.u32 4294901760, %v1310_v42  ;;  %v2194_v42 = vand.u32 4294901760, %v1327_v48 }
  0x39   :  { %755 = vmatpush.msrb.mxu3 %v754_v5  ;;  %565 = vmatpush.msrb.mxu1 %v1249_v17  ;;  %v1697_v17 = vand.u32 4294901760, %v45_v4  ;;  %v126_v5 = vsub.f32 %v1637_v3, %v2171_v16  ;;  %v777_v9 = vsub.f32 %v1651_v39, %v2169_v35  ;;  %v43_v35 = vld [vmem:[%s2134_s1 + $0x80] sm:$0xff] }
  0x3a   :  { %632 = vmatpush.msrb.mxu2 %v1556_v62  ;;  %486 = vmatpush.msrb.mxu0 %v2191_v29  ;;  %v1730_v16 = vand.u32 4294901760, %v43_v35 }
  0x3b   :  { %120 = vmatmul.f32.gmra.mxu0 %v119_v10  ;;  %261 = vmatmul.f32.gmra.mxu1 %v1487_v0  ;;  %v23_v10 = vld [vmem:[%s2135_s0 + $0x60] sm:$0xff]  ;;  %v1715_v29 = vsub.f32 %v45_v4, %v1697_v17  ;;  %v133_v4 = vand.u32 4294901760, %v1695_v22  ;;  %v127_v19 = vand.u32 4294901760, %v126_v5  ;;  %v1739_v0 = vsub.f32 %v44_v40, %v1717_v52 }
  0x3c   :  { %761 = vmatpush.msrb.mxu3 %v760_v27  ;;  %567 = vmatpush.msrb.mxu1 %v1268_v25  ;;  %v772_v27 = vand.u32 4294901760, %v771_v11  ;;  %v2193_v11 = vand.u32 4294901760, %v1673_v53  ;;  %v2196_v40 = vand.u32 4294901760, %v1352_v59 }
  0x3d   :  { %427 = vmatmul.f32.gmra.mxu3 %v117_v54  ;;  %634 = vmatpush.msrb.mxu2 %v1578_v30  ;;  %v1733_v54 = vand.u32 4294901760, %v23_v10  ;;  %v134_v48 = vsub.f32 %v1695_v22, %v133_v4 }
  0x3e   :  { %350 = vmatmul.f32.gmra.mxu2 %v1571_v37  ;;  %490 = vmatpush.msrb.mxu0 %v2192_v57  ;;  %v783_v25 = vsub.f32 %v1673_v53, %v2193_v11  ;;  %v778_v37 = vand.u32 4294901760, %v777_v9  ;;  %v794_v57 = vand.u32 4294901760, %v1715_v29 }
  0x3f   :  { %767 = vmatpush.msrb.mxu3 %v766_v60  ;;  %569 = vmatpush.msrb.mxu1 %v1275_v28  ;;  %v2195_v28 = vand.u32 4294901760, %v1686_v20  ;;  %v1750_v60 = vsub.f32 %v43_v35, %v1730_v16  ;;  %v140_v9 = vsub.f32 %v23_v10, %v1733_v54  ;;  %v25_v35 = vld [vmem:[%s2135_s0 + $0x70] sm:$0xff]  ;;  %v135_v11 = vand.u32 4294901760, %v134_v48 }
  0x40   :  { %636 = vmatpush.msrb.mxu2 %v1599_v63  ;;  %494 = vmatpush.msrb.mxu0 %v2194_v42  ;;  %v795_v59 = vsub.f32 %v1715_v29, %v794_v57 }
  0x41   :  { %773 = vmatpush.msrb.mxu3 %v772_v27  ;;  %571 = vmatpush.msrb.mxu1 %v1293_v34  ;;  %v789_v5 = vsub.f32 %v1686_v20, %v2195_v28  ;;  %v784_v34 = vand.u32 4294901760, %v783_v25  ;;  %v800_v27 = vand.u32 4294901760, %v1739_v0  ;;  %v806_v25 = vand.u32 4294901760, %v1750_v60 }
  0x42   :  { %638 = vmatpush.msrb.mxu2 %v1620_v15  ;;  %498 = vmatpush.msrb.mxu0 %v2196_v40  ;;  %v141_v42 = vand.u32 4294901760, %v140_v9 }
  0x43   :  { %128 = vmatmul.f32.gmra.mxu0 %v127_v19  ;;  %265 = vmatmul.f32.gmra.mxu1 %v1543_v45  ;;  %v2197_v19 = vand.u32 4294901760, %v1637_v3  ;;  %v790_v10 = vand.u32 4294901760, %v789_v5  ;;  %v801_v28 = vsub.f32 %v1739_v0, %v800_v27  ;;  %v2199_v5 = vand.u32 4294901760, %v1387_v26 }
  0x44   :  { %779 = vmatpush.msrb.mxu3 %v778_v37  ;;  %573 = vmatpush.msrb.mxu1 %v1319_v46  ;;  %v2198_v46 = vand.u32 4294901760, %v1370_v2  ;;  %v1774_v37 = vand.u32 4294901760, %v25_v35  ;;  %v807_v2 = vsub.f32 %v1750_v60, %v806_v25  ;;  %v142_v40 = vsub.f32 %v140_v9, %v141_v42 }
  0x45   :  { %433 = vmatmul.f32.gmra.mxu3 %v2197_v19  ;;  %640 = vmatpush.msrb.mxu2 %v1653_v38  ;;  %v802_v48 = vand.u32 4294901760, %v801_v28  ;;  %v2202_v19 = vld [vmem:[#allocation4_spill] sm:$0xff] }
  0x46   :  { %355 = vmatmul.f32.gmra.mxu2 %v1637_v3  ;;  %502 = vmatpush.msrb.mxu0 %v2198_v46  ;;  %v796_v3 = vand.u32 4294901760, %v795_v59  ;;  %v148_v26 = vsub.f32 %v25_v35, %v1774_v37  ;;  %v12_v35 = vld [vmem:[%s2135_s0 + $0x8] sm:$0xff]  ;;  %v2207_v46 = vld [vmem:[#allocation5_spill] sm:$0xff] }
  0x47   :  { %785 = vmatpush.msrb.mxu3 %v784_v34  ;;  %575 = vmatpush.msrb.mxu1 %v1333_v51  ;;  %v2200_v51 = vand.u32 4294901760, %v1410_v44  ;;  %v2201_v34 = vand.u32 4294901760, %v1425_v56  ;;  %v143_v44 = vand.u32 4294901760, %v142_v40  ;;  %v2205_v56 = vld [vmem:[#allocation3_spill] sm:$0xff] }
  0x48   :  { %642 = vmatpush.msrb.mxu2 %v1675_v21  ;;  %506 = vmatpush.msrb.mxu0 %v2199_v5  ;;  %v149_v59 = vand.u32 4294901760, %v148_v26 }
  0x49   :  { %791 = vmatpush.msrb.mxu3 %v790_v10  ;;  %577 = vmatpush.msrb.mxu1 %v1349_v58  ;;  %v808_v58 = vand.u32 4294901760, %v807_v2  ;;  %v2206_v10 = vand.u32 4294901760, %v2205_v56  ;;  %v2210_v2 = vand.u32 4294901760, %v1504_v18 }
  0x4a   :  { %644 = vmatpush.msrb.mxu2 %v1697_v17  ;;  %510 = vmatpush.msrb.mxu0 %v2200_v51 }
  0x4b   :  { %136 = vmatmul.f32.gmra.mxu0 %v135_v11  ;;  %269 = vmatmul.f32.gmra.mxu1 %v1611_v61  ;;  %v2208_v11 = vand.u32 4294901760, %v2207_v46 }
  0x4c   :  { %797 = vmatpush.msrb.mxu3 %v796_v3  ;;  %579 = vmatpush.msrb.mxu1 %v1367_v1  ;;  %v2203_v1 = vand.u32 4294901760, %v2202_v19  ;;  %v14_v3 = vld [vmem:[%s2135_s0 + $0x18] sm:$0xff] }
  0x4d   :  { %439 = vmatmul.f32.gmra.mxu3 %v133_v4  ;;  %646 = vmatpush.msrb.mxu2 %v1717_v52  ;;  %v2204_v4 = vld [vmem:[#allocation2_spill] sm:$0xff] }
  0x4e   :  { %360 = vmatmul.f32.gmra.mxu2 %v1695_v22  ;;  %514 = vmatpush.msrb.mxu0 %v2201_v34  ;;  %v1804_v22 = vand.u32 4294901760, %v12_v35  ;;  %v2216_v34 = vand.u32 4294901760, %v1627_v14 }
  0x4f   :  { %803 = vmatpush.msrb.mxu3 %v802_v48  ;;  %581 = vmatpush.msrb.mxu1 %v1379_v12  ;;  %v150_v12 = vsub.f32 %v148_v26, %v149_v59 }
  0x50   :  { %518 = vmatpush.msrb.mxu0 %v2203_v1  ;;  %648 = vmatpush.msrb.mxu2 %v1730_v16  ;;  %v1815_v28 = vsub.f32 %v12_v35, %v1804_v22  ;;  %v26_v35 = vld [vmem:[%s2135_s0 + $0x78] sm:$0xff] }
  0x51   :  { %809 = vmatpush.msrb.mxu3 %v808_v58  ;;  %583 = vmatpush.msrb.mxu1 %v2204_v4  ;;  %v151_v5 = vand.u32 4294901760, %v150_v12  ;;  %v1982_v4 = vand.u32 4294901760, %v26_v35 }
  0x52   :  { %1016 = vmatpush.msra.mxu2 %v2206_v10  ;;  %845 = vmatpush.msra.mxu0 %v2205_v56 }
  0x53   :  { %144 = vmatmul.f32.gmra.mxu0 %v143_v44  ;;  %273 = vmatmul.f32.gmra.mxu1 %v1662_v33  ;;  %v1991_v56 = vsub.f32 %v26_v35, %v1982_v4 }
  0x54   :  { %1111 = vmatpush.msra.mxu3 %v1392_v31  ;;  %933 = vmatpush.msra.mxu1 %v1392_v31  ;;  %v2209_v31 = vand.u32 4294901760, %v1485_v24 }
  0x55   :  { %445 = vmatmul.f32.gmra.mxu3 %v141_v42  ;;  %1020 = vmatpush.msra.mxu2 %v2208_v11  ;;  %v1829_v42 = vand.u32 4294901760, %v14_v3  ;;  %v707_v12 = vand.u32 4294901760, %v1991_v56 }
  0x56   :  { %365 = vmatmul.f32.gmra.mxu2 %v140_v9  ;;  %848 = vmatpush.msra.mxu0 %v2207_v46  ;;  %v651_v9 = vand.u32 4294901760, %v1815_v28 }
  0x57   :  { %1113 = vmatpush.msra.mxu3 %v1417_v50  ;;  %935 = vmatpush.msra.mxu1 %v1417_v50 }
  0x58   :  { %1024 = vmatpush.msra.mxu2 %v2209_v31  ;;  %851 = vmatpush.msra.mxu0 %v1485_v24  ;;  %v2211_v24 = vand.u32 4294901760, %v1531_v8  ;;  %v652_v50 = vsub.f32 %v1815_v28, %v651_v9 }
  0x59   :  { %1115 = vmatpush.msra.mxu3 %v1457_v13  ;;  %937 = vmatpush.msra.mxu1 %v1457_v13  ;;  %v1843_v13 = vsub.f32 %v14_v3, %v1829_v42 }
  0x5a   :  { %1028 = vmatpush.msra.mxu2 %v2210_v2  ;;  %854 = vmatpush.msra.mxu0 %v1504_v18  ;;  %v16_v18 = vld [vmem:[%s2135_s0 + $0x28] sm:$0xff]  ;;  %v653_v51 = vand.u32 4294901760, %v652_v50 }
  0x5b   :  { %152 = vmatmul.f32.gmra.mxu0 %v151_v5  ;;  %277 = vmatmul.f32.gmra.mxu1 %v1733_v54  ;;  %v1857_v40 = vand.u32 4294901760, %v16_v18 }
  0x5c   :  { %1117 = vmatpush.msra.mxu3 %v1470_v32  ;;  %939 = vmatpush.msra.mxu1 %v1470_v32  ;;  %v2212_v32 = vand.u32 4294901760, %v1553_v36 }
  0x5d   :  { %451 = vmatmul.f32.gmra.mxu3 %v149_v59  ;;  %1032 = vmatpush.msra.mxu2 %v2211_v24  ;;  %v2219_v59 = vand.u32 4294901760, %v1686_v20 }
  0x5e   :  { %370 = vmatmul.f32.gmra.mxu2 %v148_v26  ;;  %857 = vmatpush.msra.mxu0 %v1531_v8  ;;  %v659_v8 = vand.u32 4294901760, %v1843_v13  ;;  %v2213_v26 = vand.u32 4294901760, %v1568_v47 }
  0x5f   :  { %1119 = vmatpush.msra.mxu3 %v1496_v23  ;;  %941 = vmatpush.msra.mxu1 %v1496_v23  ;;  %v2214_v23 = vand.u32 4294901760, %v1592_v7 }
  0x60   :  { %1036 = vmatpush.msra.mxu2 %v2212_v32  ;;  %860 = vmatpush.msra.mxu0 %v1553_v36  ;;  %v1873_v36 = vsub.f32 %v16_v18, %v1857_v40 }
  0x61   :  { %1121 = vmatpush.msra.mxu3 %v1527_v41  ;;  %943 = vmatpush.msra.mxu1 %v1527_v41  ;;  %v660_v41 = vsub.f32 %v1843_v13, %v659_v8 }
  0x62   :  { %1040 = vmatpush.msra.mxu2 %v2213_v26  ;;  %863 = vmatpush.msra.mxu0 %v1568_v47  ;;  %v18_v47 = vld [vmem:[%s2135_s0 + $0x38] sm:$0xff] }
  0x63   :  { %281 = vmatmul.f32.gmra.mxu1 %v1774_v37  ;;  %520 = vmatmul.f32.vlgmr.msrb.gmra.mxu0 %v1372_v6  ;;  %v661_v48 = vand.u32 4294901760, %v660_v41  ;;  %v1887_v58 = vand.u32 4294901760, %v18_v47 }
  0x64   :  { %1123 = vmatpush.msra.mxu3 %v1537_v55  ;;  %945 = vmatpush.msra.mxu1 %v1537_v55  ;;  %v2215_v55 = vand.u32 4294901760, %v1614_v43 }
  0x65   :  { %811 = vmatmul.f32.vlgmr.msrb.gmra.mxu3 %v1804_v22  ;;  %1044 = vmatpush.msra.mxu2 %v2214_v23 }
  0x66   :  { %654 = vmatmul.f32.vlgmr.msrb.gmra.mxu2 %v653_v51  ;;  %866 = vmatpush.msra.mxu0 %v1592_v7  ;;  %v667_v7 = vand.u32 4294901760, %v1873_v36 }
  0x67   :  { %1125 = vmatpush.msra.mxu3 %v1556_v62  ;;  %947 = vmatpush.msra.mxu1 %v1556_v62  ;;  %v2217_v62 = vand.u32 4294901760, %v1651_v39 }
  0x68   :  { %1048 = vmatpush.msra.mxu2 %v2215_v55  ;;  %869 = vmatpush.msra.mxu0 %v1614_v43  ;;  %v1903_v43 = vsub.f32 %v18_v47, %v1887_v58 }
  0x69   :  { %1127 = vmatpush.msra.mxu3 %v1578_v30  ;;  %949 = vmatpush.msra.mxu1 %v1578_v30  ;;  %v668_v30 = vsub.f32 %v1873_v36, %v667_v7 }
  0x6a   :  { %1052 = vmatpush.msra.mxu2 %v2216_v34  ;;  %872 = vmatpush.msra.mxu0 %v1627_v14 }
  0x6b   :  { %524 = vmatmul.f32.gmra.mxu0 %v1415_v49  ;;  %585 = vmatmul.f32.vlgmr.msrb.gmra.mxu1 %v1372_v6  ;;  %v20_v6 = vld [vmem:[%s2135_s0 + $0x48] sm:$0xff]  ;;  %v669_v14 = vand.u32 4294901760, %v668_v30 }
  0x6c   :  { %1129 = vmatpush.msra.mxu3 %v1599_v63  ;;  %951 = vmatpush.msra.mxu1 %v1599_v63  ;;  %v2218_v63 = vand.u32 4294901760, %v1673_v53  ;;  %v1917_v44 = vand.u32 4294901760, %v20_v6 }
  0x6d   :  { %815 = vmatmul.f32.gmra.mxu3 %v1829_v42  ;;  %1056 = vmatpush.msra.mxu2 %v2217_v62 }
  0x6e   :  { %662 = vmatmul.f32.gmra.mxu2 %v661_v48  ;;  %875 = vmatpush.msra.mxu0 %v1651_v39  ;;  %v675_v39 = vand.u32 4294901760, %v1903_v43 }
  0x6f   :  { %1131 = vmatpush.msra.mxu3 %v1620_v15  ;;  %953 = vmatpush.msra.mxu1 %v1620_v15  ;;  %v2220_v15 = vld [vmem:[#allocation6_spill] sm:$0xff] }
  0x70   :  { %1060 = vmatpush.msra.mxu2 %v2218_v63  ;;  %878 = vmatpush.msra.mxu0 %v1673_v53  ;;  %v1933_v53 = vsub.f32 %v20_v6, %v1917_v44 }
  0x71   :  { %1133 = vmatpush.msra.mxu3 %v1653_v38  ;;  %955 = vmatpush.msra.mxu1 %v1653_v38  ;;  %v676_v38 = vsub.f32 %v1903_v43, %v675_v39 }
  0x72   :  { %1064 = vmatpush.msra.mxu2 %v2219_v59  ;;  %881 = vmatpush.msra.mxu0 %v1686_v20  ;;  %v683_v20 = vand.u32 4294901760, %v1933_v53 }
  0x73   :  { %528 = vmatmul.f32.gmra.mxu0 %v2220_v15  ;;  %589 = vmatmul.f32.gmra.mxu1 %v1415_v49  ;;  %v22_v49 = vld [vmem:[%s2135_s0 + $0x58] sm:$0xff] }
  0x74   :  { %1135 = vmatpush.msra.mxu3 %v1675_v21  ;;  %957 = vmatpush.msra.mxu1 %v1675_v21  ;;  %v677_v21 = vand.u32 4294901760, %v676_v38 }
  0x75   :  { %819 = vmatmul.f32.gmra.mxu3 %v1857_v40  ;;  %1068 = vmatpush.msra.mxu2 %v794_v57 }
  0x76   :  { %670 = vmatmul.f32.gmra.mxu2 %v669_v14  ;;  %884 = vmatpush.msra.mxu0 %v1715_v29  ;;  %v1947_v29 = vand.u32 4294901760, %v22_v49 }
  0x77   :  { %1137 = vmatpush.msra.mxu3 %v1697_v17  ;;  %959 = vmatpush.msra.mxu1 %v1697_v17 }
  0x78   :  { %1072 = vmatpush.msra.mxu2 %v800_v27  ;;  %887 = vmatpush.msra.mxu0 %v1739_v0  ;;  %v684_v0 = vsub.f32 %v1933_v53, %v683_v20  ;;  %v1961_v17 = vsub.f32 %v22_v49, %v1947_v29 }
  0x79   :  { %1139 = vmatpush.msra.mxu3 %v1717_v52  ;;  %961 = vmatpush.msra.mxu1 %v1717_v52  ;;  %v24_v52 = vld [vmem:[%s2135_s0 + $0x68] sm:$0xff] }
  0x7a   :  { %890 = vmatpush.msra.mxu0 %v1750_v60  ;;  %1076 = vmatpush.msra.mxu2 %v806_v25  ;;  %v685_v57 = vand.u32 4294901760, %v684_v0  ;;  %v691_v60 = vand.u32 4294901760, %v1961_v17  ;;  %v1967_v27 = vand.u32 4294901760, %v24_v52 }
  0x7b   :  { %532 = vmatmul.f32.gmra.mxu0 %v1543_v45  ;;  %593 = vmatmul.f32.gmra.mxu1 %v2220_v15 }
  0x7c   :  { %1141 = vmatpush.msra.mxu3 %v1730_v16  ;;  %963 = vmatpush.msra.mxu1 %v1730_v16  ;;  %v692_v16 = vsub.f32 %v1961_v17, %v691_v60  ;;  %v1976_v25 = vsub.f32 %v24_v52, %v1967_v27 }
  0x7d   :  { %823 = vmatmul.f32.gmra.mxu3 %v1887_v58 }
  0x7e   :  { %678 = vmatmul.f32.gmra.mxu2 %v677_v21  ;;  %v693_v19 = vand.u32 4294901760, %v692_v16  ;;  %v699_v1 = vand.u32 4294901760, %v1976_v25 }
  0x83   :  { %536 = vmatmul.f32.gmra.mxu0 %v1611_v61  ;;  %597 = vmatmul.f32.gmra.mxu1 %v1543_v45  ;;  %v700_v45 = vsub.f32 %v1976_v25, %v699_v1 }
  0x85   :  { %827 = vmatmul.f32.gmra.mxu3 %v1917_v44  ;;  %v701_v10 = vand.u32 4294901760, %v700_v45 }
  0x86   :  { %686 = vmatmul.f32.gmra.mxu2 %v685_v57 }
  0x8b   :  { %540 = vmatmul.f32.gmra.mxu0 %v1662_v33  ;;  %601 = vmatmul.f32.gmra.mxu1 %v1611_v61  ;;  %v708_v61 = vsub.f32 %v1991_v56, %v707_v12 }
  0x8d   :  { %831 = vmatmul.f32.gmra.mxu3 %v1947_v29  ;;  %v709_v46 = vand.u32 4294901760, %v708_v61 }
  0x8e   :  { %694 = vmatmul.f32.gmra.mxu2 %v693_v19 }
  0x93   :  { %544 = vmatmul.f32.gmra.mxu0 %v1733_v54  ;;  %605 = vmatmul.f32.gmra.mxu1 %v1662_v33 }
  0x95   :  { %835 = vmatmul.f32.gmra.mxu3 %v1967_v27 }
  0x96   :  { %702 = vmatmul.f32.gmra.mxu2 %v701_v10 }
  0x9b   :  { %548 = vmatmul.f32.gmra.mxu0 %v1774_v37  ;;  %609 = vmatmul.f32.gmra.mxu1 %v1733_v54 }
  0x9d   :  { %839 = vmatmul.f32.gmra.mxu3 %v1982_v4 }
  0x9e   :  { %710 = vmatmul.f32.gmra.mxu2 %v709_v46 }
  0xa0   :  { %v97_v11 = vpop.f32.mrf.mxu0 }
  0xa3   :  { %613 = vmatmul.f32.gmra.mxu1 %v1774_v37  ;;  %893 = vmatmul.f32.vlgmr.msra.gmra.mxu0 %v1815_v28 }
  0xa5   :  { %1143 = vmatmul.f32.vlgmr.msra.gmra.mxu3 %v1804_v22 }
  0xa6   :  { %1078 = vmatmul.f32.vlgmr.msra.gmra.mxu2 %v1804_v22 }
  0xa8   :  { %v105_v33 = vpop.f32.mrf.mxu0  ;;  %v254_v5 = vpop.f32.mrf.mxu1 }
  0xa9   :  { %v255_v3 = vadd.f32 %v254_v5, %v97_v11  ;;  %v336_v31 = vpop.f32.mrf.mxu2  ;;  %v410_v2 = vpop.f32.mrf.mxu3 }
  0xab   :  { %v337_v24 = vadd.f32 %v336_v31, %v255_v3  ;;  %898 = vmatmul.f32.gmra.mxu0 %v1843_v13  ;;  %967 = vmatmul.f32.vlgmr.msra.gmra.mxu1 %v651_v9 }
  0xad   :  { %v2010_v54 = vadd.f32 %v410_v2, %v337_v24  ;;  %1147 = vmatmul.f32.gmra.mxu3 %v1829_v42 }
  0xae   :  { %1082 = vmatmul.f32.gmra.mxu2 %v1829_v42 }
  0xb0   :  { %v113_v37 = vpop.f32.mrf.mxu0  ;;  %v258_v50 = vpop.f32.mrf.mxu1 }
  0xb1   :  { %v259_v22 = vadd.f32 %v258_v50, %v105_v33  ;;  %v341_v18 = vpop.f32.mrf.mxu2  ;;  %v416_v32 = vpop.f32.mrf.mxu3 }
  0xb3   :  { %v342_v51 = vadd.f32 %v341_v18, %v259_v22  ;;  %903 = vmatmul.f32.gmra.mxu0 %v1873_v36  ;;  %973 = vmatmul.f32.gmra.mxu1 %v659_v8 }
  0xb5   :  { %v2017_v26 = vadd.f32 %v416_v32, %v342_v51  ;;  %1151 = vmatmul.f32.gmra.mxu3 %v1857_v40 }
  0xb6   :  { %1086 = vmatmul.f32.gmra.mxu2 %v1857_v40 }
  0xb8   :  { %v121_v28 = vpop.f32.mrf.mxu0  ;;  %v262_v9 = vpop.f32.mrf.mxu1 }
  0xb9   :  { %v263_v42 = vadd.f32 %v262_v9, %v113_v37  ;;  %v346_v23 = vpop.f32.mrf.mxu2  ;;  %v422_v41 = vpop.f32.mrf.mxu3 }
  0xbb   :  { %v347_v47 = vadd.f32 %v346_v23, %v263_v42  ;;  %908 = vmatmul.f32.gmra.mxu0 %v1903_v43  ;;  %979 = vmatmul.f32.gmra.mxu1 %v667_v7 }
  0xbd   :  { %v2024_v55 = vadd.f32 %v422_v41, %v347_v47  ;;  %1155 = vmatmul.f32.gmra.mxu3 %v1887_v58 }
  0xbe   :  { %1090 = vmatmul.f32.gmra.mxu2 %v1887_v58 }
  0xc0   :  { %v129_v13 = vpop.f32.mrf.mxu0  ;;  %v266_v8 = vpop.f32.mrf.mxu1 }
  0xc1   :  { %v267_v40 = vadd.f32 %v266_v8, %v121_v28  ;;  %v351_v48 = vpop.f32.mrf.mxu2  ;;  %v428_v34 = vpop.f32.mrf.mxu3 }
  0xc3   :  { %v352_v62 = vadd.f32 %v351_v48, %v267_v40  ;;  %913 = vmatmul.f32.gmra.mxu0 %v1933_v53  ;;  %985 = vmatmul.f32.gmra.mxu1 %v675_v39 }
  0xc5   :  { %v2031_v30 = vadd.f32 %v428_v34, %v352_v62  ;;  %1159 = vmatmul.f32.gmra.mxu3 %v1917_v44 }
  0xc6   :  { %1094 = vmatmul.f32.gmra.mxu2 %v1917_v44 }
  0xc8   :  { %v137_v36 = vpop.f32.mrf.mxu0  ;;  %v270_v7 = vpop.f32.mrf.mxu1 }
  0xc9   :  { %v271_v58 = vadd.f32 %v270_v7, %v129_v13  ;;  %v356_v6 = vpop.f32.mrf.mxu2  ;;  %v434_v63 = vpop.f32.mrf.mxu3 }
  0xcb   :  { %v357_v14 = vadd.f32 %v356_v6, %v271_v58  ;;  %918 = vmatmul.f32.gmra.mxu0 %v1961_v17  ;;  %991 = vmatmul.f32.gmra.mxu1 %v683_v20 }
  0xcd   :  { %v2038_v59 = vadd.f32 %v434_v63, %v357_v14  ;;  %1163 = vmatmul.f32.gmra.mxu3 %v1947_v29 }
  0xce   :  { %1098 = vmatmul.f32.gmra.mxu2 %v1947_v29 }
  0xd0   :  { %v145_v43 = vpop.f32.mrf.mxu0  ;;  %v274_v39 = vpop.f32.mrf.mxu1 }
  0xd1   :  { %v275_v44 = vadd.f32 %v274_v39, %v137_v36  ;;  %v361_v15 = vpop.f32.mrf.mxu2  ;;  %v440_v38 = vpop.f32.mrf.mxu3 }
  0xd3   :  { %v362_v49 = vadd.f32 %v361_v15, %v275_v44  ;;  %923 = vmatmul.f32.gmra.mxu0 %v1976_v25  ;;  %997 = vmatmul.f32.gmra.mxu1 %v691_v60 }
  0xd5   :  { %v2045_v21 = vadd.f32 %v440_v38, %v362_v49  ;;  %1167 = vmatmul.f32.gmra.mxu3 %v1967_v27 }
  0xd6   :  { %1102 = vmatmul.f32.gmra.mxu2 %v1967_v27 }
  0xd8   :  { %v153_v53 = vpop.f32.mrf.mxu0  ;;  %v278_v20 = vpop.f32.mrf.mxu1 }
  0xd9   :  { %v279_v29 = vadd.f32 %v278_v20, %v145_v43  ;;  %v366_v0 = vpop.f32.mrf.mxu2  ;;  %v446_v52 = vpop.f32.mrf.mxu3 }
  0xdb   :  { %v367_v57 = vadd.f32 %v366_v0, %v279_v29  ;;  %928 = vmatmul.f32.gmra.mxu0 %v1991_v56  ;;  %1003 = vmatmul.f32.gmra.mxu1 %v699_v1 }
  0xdd   :  { %v2052_v16 = vadd.f32 %v446_v52, %v367_v57  ;;  %1171 = vmatmul.f32.gmra.mxu3 %v1982_v4 }
  0xde   :  { %1106 = vmatmul.f32.gmra.mxu2 %v1982_v4 }
  0xe0   :  { %v282_v17 = vpop.f32.mrf.mxu1  ;;  %v521_v60 = vpop.f32.mrf.mxu0 }
  0xe1   :  { %v283_v27 = vadd.f32 %v282_v17, %v153_v53  ;;  %v371_v35 = vpop.f32.mrf.mxu2  ;;  %v452_v19 = vpop.f32.mrf.mxu3  ;;  %v522_v40 = vadd.f32 %v521_v60, %v2010_v54 }
  0xe3   :  { %v372_v45 = vadd.f32 %v371_v35, %v283_v27  ;;  %1009 = vmatmul.f32.gmra.mxu1 %v707_v12 }
  0xe5   :  { %v2058_v10 = vadd.f32 %v452_v19, %v372_v45 }
  0xe8   :  { %v525_v61 = vpop.f32.mrf.mxu0  ;;  %v586_v25 = vpop.f32.mrf.mxu1 }
  0xe9   :  { %v655_v1 = vpop.f32.mrf.mxu2  ;;  %v812_v46 = vpop.f32.mrf.mxu3  ;;  %v587_v48 = vadd.f32 %v586_v25, %v522_v40  ;;  %v526_v6 = vadd.f32 %v525_v61, %v2017_v26 }
  0xeb   :  { %v656_v36 = vadd.f32 %v655_v1, %v587_v48 }
  0xed   :  { %v813_v63 = vadd.f32 %v812_v46, %v656_v36 }
  0xf0   :  { %v529_v11 = vpop.f32.mrf.mxu0  ;;  %v590_v33 = vpop.f32.mrf.mxu1 }
  0xf1   :  { %v663_v5 = vpop.f32.mrf.mxu2  ;;  %v816_v3 = vpop.f32.mrf.mxu3  ;;  %v591_v14 = vadd.f32 %v590_v33, %v526_v6  ;;  %v530_v53 = vadd.f32 %v529_v11, %v2024_v55 }
  0xf3   :  { %v664_v15 = vadd.f32 %v663_v5, %v591_v14 }
  0xf5   :  { %v817_v29 = vadd.f32 %v816_v3, %v664_v15 }
  0xf8   :  { %v533_v4 = vpop.f32.mrf.mxu0  ;;  %v594_v31 = vpop.f32.mrf.mxu1 }
  0xf9   :  { %v671_v2 = vpop.f32.mrf.mxu2  ;;  %v820_v24 = vpop.f32.mrf.mxu3  ;;  %v595_v0 = vadd.f32 %v594_v31, %v530_v53  ;;  %v534_v45 = vadd.f32 %v533_v4, %v2031_v30 }
  0xfb   :  { %v672_v60 = vadd.f32 %v671_v2, %v595_v0 }
  0xfd   :  { %v821_v25 = vadd.f32 %v820_v24, %v672_v60 }
 0x100   :  { %v537_v37 = vpop.f32.mrf.mxu0  ;;  %v598_v50 = vpop.f32.mrf.mxu1 }
 0x101   :  { %v679_v22 = vpop.f32.mrf.mxu2  ;;  %v824_v18 = vpop.f32.mrf.mxu3  ;;  %v599_v55 = vadd.f32 %v598_v50, %v534_v45  ;;  %v538_v40 = vadd.f32 %v537_v37, %v2038_v59 }
 0x103   :  { %v680_v5 = vadd.f32 %v679_v22, %v599_v55 }
 0x108   :  { %v2060_v56 = vpop.f32.mrf.mxu0  ;;  %v602_v12 = vpop.f32.mrf.mxu1 }
 0x109   :  { %v2062_v32 = vpop.f32.mrf.mxu2  ;;  %v2064_v51 = vpop.f32.mrf.mxu3  ;;  %v603_v30 = vadd.f32 %v602_v12, %v538_v40 }
 0x10b   :  { %v688_v6 = vadd.f32 %v2062_v32, %v603_v30 }
 0x10d   :  { %v829_v37 = vadd.f32 %v2064_v51, %v688_v6 }
 0x110   :  { %v2066_v28 = vpop.f32.mrf.mxu0  ;;  %v2068_v9 = vpop.f32.mrf.mxu1 }
 0x111   :  { %v2070_v42 = vpop.f32.mrf.mxu2  ;;  %v2072_v23 = vpop.f32.mrf.mxu3 }
 0x118   :  { %v2074_v41 = vpop.f32.mrf.mxu0  ;;  %v2076_v47 = vpop.f32.mrf.mxu1 }
 0x119   :  { %v2078_v13 = vpop.f32.mrf.mxu2  ;;  %v2080_v8 = vpop.f32.mrf.mxu3 }
 0x120   :  { %v2083_v34 = vpop.f32.mrf.mxu1  ;;  %v894_v62 = vpop.f32.mrf.mxu0 }
 0x121   :  { %v2085_v7 = vpop.f32.mrf.mxu2  ;;  %v2087_v58 = vpop.f32.mrf.mxu3  ;;  %v895_v43 = vadd.f32 %v894_v62, %v813_v63  ;;  %v825_v62 = vadd.f32 %v824_v18, %v680_v5 }
 0x128   :  { %v899_v39 = vpop.f32.mrf.mxu0  ;;  %v968_v44 = vpop.f32.mrf.mxu1 }
 0x129   :  { %v969_v38 = vadd.f32 %v968_v44, %v895_v43  ;;  %v1079_v49 = vpop.f32.mrf.mxu2  ;;  %v1144_v54 = vpop.f32.mrf.mxu3  ;;  %v900_v57 = vadd.f32 %v899_v39, %v817_v29  ;;  %v542_v43 = vadd.f32 %v2060_v56, %v2045_v21  ;;  %v546_v21 = vadd.f32 %v2066_v28, %v2052_v16 }
 0x12a   :  { %v550_v16 = vadd.f32 %v2074_v41, %v2058_v10 }
 0x12b   :  { %v1080_v20 = vadd.f32 %v1079_v49, %v969_v38  ;;  %v607_v18 = vadd.f32 %v2068_v9, %v542_v43  ;;  %v611_v9 = vadd.f32 %v2076_v47, %v546_v21 }
 0x12c   :  { %v615_v47 = vadd.f32 %v2083_v34, %v550_v16 }
 0x12d   :  { %v1145_v52 = vadd.f32 %v1144_v54, %v1080_v20  ;;  %v696_v32 = vadd.f32 %v2070_v42, %v607_v18  ;;  %v704_v42 = vadd.f32 %v2078_v13, %v611_v9 }
 0x12e   :  { %v712_v13 = vadd.f32 %v2085_v7, %v615_v47 }
 0x12f   :  { %1175 = vst [vmem:[%s2136_s2] sm:$0xff] %v1145_v52  ;;  %v833_v51 = vadd.f32 %v2072_v23, %v696_v32  ;;  %v837_v23 = vadd.f32 %v2080_v8, %v704_v42 }
 0x130   :  { %v904_v26 = vpop.f32.mrf.mxu0  ;;  %v974_v17 = vpop.f32.mrf.mxu1  ;;  %v841_v10 = vadd.f32 %v2087_v58, %v712_v13 }
 0x131   :  { %v975_v27 = vadd.f32 %v974_v17, %v900_v57  ;;  %v1083_v35 = vpop.f32.mrf.mxu2  ;;  %v1148_v19 = vpop.f32.mrf.mxu3  ;;  %v905_v46 = vadd.f32 %v904_v26, %v821_v25 }
 0x133   :  { %v1084_v61 = vadd.f32 %v1083_v35, %v975_v27 }
 0x135   :  { %v1149_v1 = vadd.f32 %v1148_v19, %v1084_v61 }
 0x137   :  { %1176 = vst [vmem:[%s2136_s2 + $0x8] sm:$0xff] %v1149_v1 }
 0x138   :  { %v909_v11 = vpop.f32.mrf.mxu0  ;;  %v980_v33 = vpop.f32.mrf.mxu1 }
 0x139   :  { %v981_v3 = vadd.f32 %v980_v33, %v905_v46  ;;  %v1087_v31 = vpop.f32.mrf.mxu2  ;;  %v1152_v2 = vpop.f32.mrf.mxu3  ;;  %v910_v24 = vadd.f32 %v909_v11, %v825_v62 }
 0x13b   :  { %v1088_v48 = vadd.f32 %v1087_v31, %v981_v3 }
 0x13d   :  { %v1153_v4 = vadd.f32 %v1152_v2, %v1088_v48 }
 0x13f   :  { %1177 = vst [vmem:[%s2136_s2 + $0x10] sm:$0xff] %v1153_v4 }
 0x140   :  { %v914_v50 = vpop.f32.mrf.mxu0  ;;  %v986_v36 = vpop.f32.mrf.mxu1 }
 0x141   :  { %v987_v63 = vadd.f32 %v986_v36, %v910_v24  ;;  %v1091_v22 = vpop.f32.mrf.mxu2  ;;  %v1156_v14 = vpop.f32.mrf.mxu3  ;;  %v915_v39 = vadd.f32 %v914_v50, %v829_v37 }
 0x143   :  { %v1092_v59 = vadd.f32 %v1091_v22, %v987_v63 }
 0x145   :  { %v1157_v12 = vadd.f32 %v1156_v14, %v1092_v59 }
 0x147   :  { %1178 = vst [vmem:[%s2136_s2 + $0x18] sm:$0xff] %v1157_v12 }
 0x148   :  { %v919_v44 = vpop.f32.mrf.mxu0  ;;  %v992_v15 = vpop.f32.mrf.mxu1 }
 0x149   :  { %v993_v38 = vadd.f32 %v992_v15, %v915_v39  ;;  %v1095_v49 = vpop.f32.mrf.mxu2  ;;  %v1160_v54 = vpop.f32.mrf.mxu3  ;;  %v920_v20 = vadd.f32 %v919_v44, %v833_v51 }
 0x14b   :  { %v1096_v56 = vadd.f32 %v1095_v49, %v993_v38 }
 0x14d   :  { %v1161_v53 = vadd.f32 %v1160_v54, %v1096_v56 }
 0x14f   :  { %1179 = vst [vmem:[%s2136_s2 + $0x20] sm:$0xff] %v1161_v53 }
 0x150   :  { %v998_v29 = vpop.f32.mrf.mxu1  ;;  %v924_v26 = vpop.f32.mrf.mxu0 }
 0x151   :  { %v999_v0 = vadd.f32 %v998_v29, %v920_v20  ;;  %v1099_v52 = vpop.f32.mrf.mxu2  ;;  %v1164_v57 = vpop.f32.mrf.mxu3  ;;  %v925_v60 = vadd.f32 %v924_v26, %v837_v23 }
 0x153   :  { %v1100_v28 = vadd.f32 %v1099_v52, %v999_v0 }
 0x155   :  { %v1165_v17 = vadd.f32 %v1164_v57, %v1100_v28 }
 0x157   :  { %1180 = vst [vmem:[%s2136_s2 + $0x28] sm:$0xff] %v1165_v17 }
 0x158   :  { %v1004_v27 = vpop.f32.mrf.mxu1  ;;  %v929_v25 = vpop.f32.mrf.mxu0 }
 0x159   :  { %v1005_v35 = vadd.f32 %v1004_v27, %v925_v60  ;;  %v1103_v19 = vpop.f32.mrf.mxu2  ;;  %v1168_v45 = vpop.f32.mrf.mxu3  ;;  %v930_v8 = vadd.f32 %v929_v25, %v841_v10 }
 0x15b   :  { %v1104_v61 = vadd.f32 %v1103_v19, %v1005_v35 }
 0x15d   :  { %v1169_v41 = vadd.f32 %v1168_v45, %v1104_v61 }
 0x15f   :  { %1181 = vst [vmem:[%s2136_s2 + $0x30] sm:$0xff] %v1169_v41 }
 0x160   :  { %v1010_v34 = vpop.f32.mrf.mxu1 }
 0x161   :  { %v1011_v55 = vadd.f32 %v1010_v34, %v930_v8  ;;  %v1107_v1 = vpop.f32.mrf.mxu2  ;;  %v1172_v46 = vpop.f32.mrf.mxu3 }
 0x163   :  { %v1108_v11 = vadd.f32 %v1107_v1, %v1011_v55 }
 0x165   :  { %v1173_v33 = vadd.f32 %v1172_v46, %v1108_v11 }
 0x167   :  { %1182 = vst [vmem:[%s2136_s2 + $0x38] sm:$0xff] %v1173_v33 }

</bundles_post_ra>
